<compile_context>
chip_gen: v6e
topology: v6e:2x2x1
jax: 0.10.0
libtpu: 0.0.40
codegen_flags: <defaults>
</compile_context>

<pallas_src>
import functools

import jax
import jax.numpy as jnp
from jax.experimental import pallas as pl
from jax.experimental.pallas import tpu as pltpu


def _fcu_down_kernel(x_ref, w_ref, p_ref, cls_ref, o_ref, *, dw, tLp, eps):
    """One (batch row, sequence tile) grid step.

    x_ref:   (1, Cin, tLp*dw)  native NCL input tile (f32)
    w_ref:   (Cin, Cout)       conv weight with the 1/dw pool scale folded in
    p_ref:   (3, Cout)         rows = [conv bias, LN gamma, LN beta] (f32)
    cls_ref: (1, 1, Cout)      x_t class token for this batch row
    o_ref:   (1, 1+Lp, Cout)   full output row, resident across sequence tiles
    """
    j = pl.program_id(1)
    cin = x_ref.shape[1]

    # In-kernel channels-last transpose (XLU); expected to hide under the
    # x-tile HBM DMA on a memory-bound kernel.
    xt = x_ref[0].T                                           # (tL, Cin) f32

    # AvgPool1d(kernel=stride=dw) BEFORE the conv: sum dw sublane slices on the
    # VPU (the 1/dw scale lives in w_ref). Static reshape + integer indexing
    # only -- no strided ref reads.
    if dw == 1:
        pooled = xt
    else:
        xg = xt.reshape(tLp, dw, cin)
        pooled = xg[:, 0, :]
        for k in range(1, dw):
            pooled = pooled + xg[:, k, :]
    # pooled: (tLp, Cin) in f32

    # 1x1 Conv1d == per-position channel matmul on the MXU (f32 accumulation).
    y = jnp.dot(pooled.astype(w_ref.dtype), w_ref[...],
                preferred_element_type=jnp.float32)           # (tLp, Cout)
    y = y + p_ref[0:1, :]                                     # conv bias

    # LayerNorm over channels (f32; biased variance, eps inside the sqrt).
    mean = jnp.mean(y, axis=-1, keepdims=True)
    var = jnp.mean(jnp.square(y - mean), axis=-1, keepdims=True)
    y = (y - mean) * jax.lax.rsqrt(var + eps)
    y = y * p_ref[1:2, :] + p_ref[2:3, :]

    # ReLU (module default act_layer=nn.ReLU).
    y = jnp.maximum(y, 0.0)

    # Direct stores (no concatenate): class token once per batch row, then this
    # tile's activation rows at offset 1 + j*tLp (constant sublane phase since
    # tLp % 8 == 0 whenever the sequence axis is actually tiled).
    @pl.when(j == 0)
    def _():
        o_ref[0, 0:1, :] = cls_ref[0].astype(o_ref.dtype)

    o_ref[0, pl.ds(1 + j * tLp, tLp), :] = y.astype(o_ref.dtype)


def _pick_seq_tile(Lp, dw, max_tile):
    """Largest Lp-divisor <= max_tile with a lane-aligned x tile (tLp*dw % 128 == 0)."""
    if Lp <= max_tile:
        return Lp
    for t in range(max_tile, 0, -1):
        if Lp % t == 0 and (t * dw) % 128 == 0:
            return t
    return Lp  # fall back to the full sequence (block == full dim, always legal)


def fcu_down(x, x_t, w, b, gamma, beta, dw_stride, eps=1e-6,
             matmul_dtype=jnp.bfloat16, out_dtype=jnp.bfloat16,
             max_seq_tile=512):
    """FCUDown forward.

    x:   (B, Cin, L)  NCL layout as fed to nn.Conv1d (consumed directly, no transpose)
    x_t: (B, S, Cout) transformer tokens (only x_t[:, 0] is used)
    w:   (Cin, Cout)  == conv_project.weight[:, :, 0].T
    b, gamma, beta: (Cout,)
    """
    B, Cin, L = x.shape
    Cout = w.shape[1]
    # TODO(synk): PyTorch AvgPool1d silently drops a trailing partial window;
    # this kernel requires L % dw_stride == 0 instead.
    assert L % dw_stride == 0, "FCUDown kernel assumes L % dw_stride == 0"
    Lp = L // dw_stride
    tLp = _pick_seq_tile(Lp, dw_stride, max_seq_tile)
    J = Lp // tLp
    tL = tLp * dw_stride
    if out_dtype is None:
        out_dtype = x_t.dtype

    # Glue (plain JAX, no extra HBM pass over x): cls-token slice, param
    # packing, 1/dw AvgPool scale folded into the conv weight, MXU-dtype cast.
    cls = x_t[:, 0:1, :]                                        # (B, 1, Cout)
    w_mat = (w.astype(jnp.float32) / dw_stride).astype(matmul_dtype)
    params = jnp.stack([b, gamma, beta]).astype(jnp.float32)    # (3, Cout)

    kernel = functools.partial(_fcu_down_kernel, dw=dw_stride, tLp=tLp, eps=eps)

    # VMEM budget with the actual dtypes: double-buffered blocks + in-kernel
    # transpose/pool/matmul temporaries + headroom, capped at 56 MiB (safe
    # under v7x's 64 MiB physical VMEM).
    def rup(n, m):
        return ((n + m - 1) // m) * m

    def isz(dt):
        return jnp.dtype(dt).itemsize

    x_blk = rup(Cin, 8) * rup(tL, 128) * isz(x.dtype)
    w_blk = rup(Cin, 8) * rup(Cout, 128) * isz(matmul_dtype)
    o_blk = rup(Lp + 1, 8) * rup(Cout, 128) * isz(out_dtype)
    p_blk = 8 * rup(Cout, 128) * 4
    c_blk = 8 * rup(Cout, 128) * isz(x_t.dtype)
    tmp = (rup(tL, 8) * rup(Cin, 128)            # transposed x tile
           + rup(tLp, 8) * rup(Cin, 128)         # pooled
           + 2 * rup(tLp, 8) * rup(Cout, 128)) * 4   # y + LN temporaries
    need = 2 * (x_blk + w_blk + o_blk + p_blk + c_blk) + tmp
    vmem_limit = int(min(max(2 * need + (4 << 20), 16 << 20), 56 << 20))

    bytes_accessed = (B * Cin * L * isz(x.dtype)
                      + B * (Lp + 1) * Cout * isz(out_dtype)
                      + Cin * Cout * isz(matmul_dtype)
                      + B * Cout * isz(x_t.dtype))
    cost = pl.CostEstimate(flops=int(2 * B * Lp * Cin * Cout + B * Cin * L),
                           transcendentals=int(B * Lp),
                           bytes_accessed=int(bytes_accessed))

    # TODO(synk): for B == 1 on v7x megacore, tile out_specs per sequence tile
    # (with the cls row written separately) so the j axis can be "parallel".
    return pl.pallas_call(
        kernel,
        out_shape=jax.ShapeDtypeStruct((B, Lp + 1, Cout), out_dtype),
        grid_spec=pltpu.PrefetchScalarGridSpec(
            num_scalar_prefetch=0,
            grid=(B, J),
            in_specs=[
                pl.BlockSpec((1, Cin, tL), lambda bi, j: (bi, 0, j)),   # x (NCL)
                pl.BlockSpec((Cin, Cout), lambda bi, j: (0, 0)),        # weight
                pl.BlockSpec((3, Cout), lambda bi, j: (0, 0)),          # b/gamma/beta
                pl.BlockSpec((1, 1, Cout), lambda bi, j: (bi, 0, 0)),   # cls token
            ],
            out_specs=pl.BlockSpec((1, Lp + 1, Cout), lambda bi, j: (bi, 0, 0)),
        ),
        compiler_params=pltpu.CompilerParams(
            dimension_semantics=("parallel", "arbitrary"),
            vmem_limit_bytes=vmem_limit),
        cost_estimate=cost,
    )(x, w_mat, params, cls)


def fcu_down_ref(x, x_t, w, b, gamma, beta, dw_stride, eps=1e-6):
    """Pure-JAX reference mirroring the PyTorch forward (f32 everywhere)."""
    B, Cin, L = x.shape
    Cout = w.shape[1]
    Lp = L // dw_stride
    y = jnp.einsum("bcl,co->bol", x, w,
                   precision=jax.lax.Precision.HIGHEST) + b[None, :, None]
    y = y.reshape(B, Cout, Lp, dw_stride).mean(axis=-1)          # avg pool
    y = jnp.transpose(y, (0, 2, 1))                              # (B, Lp, Cout)
    mean = y.mean(axis=-1, keepdims=True)
    var = ((y - mean) ** 2).mean(axis=-1, keepdims=True)
    y = (y - mean) / jnp.sqrt(var + eps) * gamma + beta          # LayerNorm
    y = jnp.maximum(y, 0.0)                                      # ReLU
    return jnp.concatenate([x_t[:, 0:1, :], y], axis=1)


if __name__ == "__main__":
    # Small shapes consistent with the module: Conv1d input (B, inplanes, L).
    B, inplanes, outplanes, L, dw_stride, seq_t = 2, 16, 32, 16, 4, 5

    key = jax.random.PRNGKey(0)
    kx, kt, kw, kb = jax.random.split(key, 4)
    x = jax.random.normal(kx, (B, inplanes, L), dtype=jnp.float32)
    x_t = jax.random.normal(kt, (B, seq_t, outplanes), dtype=jnp.float32)

    # Deterministic parameter init (conv weight stored channels-last: (Cin, Cout)).
    w = jax.random.normal(kw, (inplanes, outplanes), dtype=jnp.float32) * 0.1
    b = jax.random.normal(kb, (outplanes,), dtype=jnp.float32) * 0.1
    gamma = jnp.ones((outplanes,), dtype=jnp.float32)   # LayerNorm default init
    beta = jnp.zeros((outplanes,), dtype=jnp.float32)

    ref = fcu_down_ref(x, x_t, w, b, gamma, beta, dw_stride)
    Lp1 = L // dw_stride + 1

    # Exact-dtype path (f32 matmul, f32 output): checked against the reference
    # with a tolerance that also covers TPU default-precision f32 matmuls.
    out_f32 = jax.block_until_ready(
        fcu_down(x, x_t, w, b, gamma, beta, dw_stride,
                 matmul_dtype=jnp.float32, out_dtype=jnp.float32))
    assert out_f32.shape == (B, Lp1, outplanes), out_f32.shape
    assert jnp.allclose(out_f32, ref, rtol=3e-2, atol=3e-2), \
        float(jnp.max(jnp.abs(out_f32 - ref)))

    # Default perf path (bf16 matmul + bf16 output): bf16-level tolerance.
    out_bf16 = jax.block_until_ready(
        fcu_down(x, x_t, w, b, gamma, beta, dw_stride))
    assert out_bf16.shape == (B, Lp1, outplanes), out_bf16.shape
    assert out_bf16.dtype == jnp.bfloat16
    err = float(jnp.max(jnp.abs(out_bf16.astype(jnp.float32) - ref)))
    assert err < 1e-1, err

    print("KERNEL_OK")
</pallas_src>

<mosaic_0001>
module attributes {stable_mosaic.version = 11 : i64} {
  func.func @_fcu_down_kernel(%arg0: i32, %arg1: i32, %arg2: memref<1x16x16xf32, #tpu.memory_space<vmem>>, %arg3: memref<16x32xf32, #tpu.memory_space<vmem>>, %arg4: memref<3x32xf32, #tpu.memory_space<vmem>>, %arg5: memref<1x1x32xf32, #tpu.memory_space<vmem>>, %arg6: memref<1x5x32xf32, #tpu.memory_space<vmem>>) attributes {dimension_semantics = [#tpu.dimension_semantics<parallel>, #tpu.dimension_semantics<arbitrary>], iteration_bounds = array<i64: 2, 1>, scalar_prefetch = 0 : i64, scratch_operands = 0 : i64, tpu.core_type = #tpu.core_type<tc>, window_params = [{transform_indices = @transform_0, window_bounds = array<i64: 1, 16, 16>}, {pipeline_mode = #tpu.pipeline_mode<synchronous>, transform_indices = @transform_1, window_bounds = array<i64: 16, 32>}, {pipeline_mode = #tpu.pipeline_mode<synchronous>, transform_indices = @transform_2, window_bounds = array<i64: 3, 32>}, {transform_indices = @transform_3, window_bounds = array<i64: 1, 1, 32>}, {transform_indices = @transform_4, window_bounds = array<i64: 1, 5, 32>}]} {
    %c0 = arith.constant 0 : index
    %c0_0 = arith.constant 0 : index
    %c0_1 = arith.constant 0 : index
    %0 = vector.load %arg2[%c0, %c0_0, %c0_1] : memref<1x16x16xf32, #tpu.memory_space<vmem>>, vector<1x16x16xf32>
    %1 = vector.shape_cast %0 : vector<1x16x16xf32> to vector<16x16xf32>
    %2 = tpu.transpose %1, [1, 0] : vector<16x16xf32> -> vector<16x16xf32>
    %3 = vector.shape_cast %2 : vector<16x16xf32> to vector<4x4x16xf32>
    %4 = vector.extract_strided_slice %3 {offsets = [0, 0, 0], sizes = [4, 1, 16], strides = [1, 1, 1]} : vector<4x4x16xf32> to vector<4x1x16xf32>
    %5 = vector.shape_cast %4 : vector<4x1x16xf32> to vector<4x16xf32>
    %6 = vector.extract_strided_slice %3 {offsets = [0, 1, 0], sizes = [4, 1, 16], strides = [1, 1, 1]} : vector<4x4x16xf32> to vector<4x1x16xf32>
    %7 = vector.shape_cast %6 : vector<4x1x16xf32> to vector<4x16xf32>
    %8 = arith.addf %5, %7 : vector<4x16xf32>
    %9 = vector.extract_strided_slice %3 {offsets = [0, 2, 0], sizes = [4, 1, 16], strides = [1, 1, 1]} : vector<4x4x16xf32> to vector<4x1x16xf32>
    %10 = vector.shape_cast %9 : vector<4x1x16xf32> to vector<4x16xf32>
    %11 = arith.addf %8, %10 : vector<4x16xf32>
    %12 = vector.extract_strided_slice %3 {offsets = [0, 3, 0], sizes = [4, 1, 16], strides = [1, 1, 1]} : vector<4x4x16xf32> to vector<4x1x16xf32>
    %13 = vector.shape_cast %12 : vector<4x1x16xf32> to vector<4x16xf32>
    %14 = arith.addf %11, %13 : vector<4x16xf32>
    %c0_2 = arith.constant 0 : index
    %c0_3 = arith.constant 0 : index
    %15 = vector.load %arg3[%c0_2, %c0_3] : memref<16x32xf32, #tpu.memory_space<vmem>>, vector<16x32xf32>
    %cst = arith.constant dense<0.000000e+00> : vector<4x32xf32>
    %16 = tpu.matmul %14, %15, %cst {dimension_numbers = #tpu.dot_dimension_numbers<[1], [0], [0], [1], [0, 0, 1, 1], [], []>} : vector<4x16xf32>, vector<16x32xf32>, vector<4x32xf32> -> vector<4x32xf32>
    %c0_4 = arith.constant 0 : index
    %c0_5 = arith.constant 0 : index
    %17 = vector.load %arg4[%c0_4, %c0_5] : memref<3x32xf32, #tpu.memory_space<vmem>>, vector<1x32xf32>
    %18 = vector.broadcast %17 : vector<1x32xf32> to vector<4x32xf32>
    %19 = arith.addf %16, %18 : vector<4x32xf32>
    %cst_6 = arith.constant dense<0.000000e+00> : vector<4xf32>
    %20 = vector.multi_reduction <add>, %19, %cst_6 [1] : vector<4x32xf32> to vector<4xf32>
    %21 = vector.shape_cast %20 : vector<4xf32> to vector<4x1xf32>
    %cst_7 = arith.constant 3.200000e+01 : f32
    %22 = vector.broadcast %cst_7 : f32 to vector<4x1xf32>
    %23 = arith.divf %21, %22 : vector<4x1xf32>
    %24 = vector.broadcast %23 : vector<4x1xf32> to vector<4x32xf32>
    %25 = arith.subf %19, %24 : vector<4x32xf32>
    %26 = arith.mulf %25, %25 : vector<4x32xf32>
    %cst_8 = arith.constant dense<0.000000e+00> : vector<4xf32>
    %27 = vector.multi_reduction <add>, %26, %cst_8 [1] : vector<4x32xf32> to vector<4xf32>
    %28 = vector.shape_cast %27 : vector<4xf32> to vector<4x1xf32>
    %cst_9 = arith.constant 3.200000e+01 : f32
    %29 = vector.broadcast %cst_9 : f32 to vector<4x1xf32>
    %30 = arith.divf %28, %29 : vector<4x1xf32>
    %31 = vector.broadcast %23 : vector<4x1xf32> to vector<4x32xf32>
    %32 = arith.subf %19, %31 : vector<4x32xf32>
    %cst_10 = arith.constant 9.99999997E-7 : f32
    %33 = vector.broadcast %cst_10 : f32 to vector<4x1xf32>
    %34 = arith.addf %30, %33 : vector<4x1xf32>
    %35 = math.rsqrt %34 : vector<4x1xf32>
    %36 = vector.broadcast %35 : vector<4x1xf32> to vector<4x32xf32>
    %37 = arith.mulf %32, %36 : vector<4x32xf32>
    %c1 = arith.constant 1 : index
    %c0_11 = arith.constant 0 : index
    %38 = vector.load %arg4[%c1, %c0_11] : memref<3x32xf32, #tpu.memory_space<vmem>>, vector<1x32xf32>
    %39 = vector.broadcast %38 : vector<1x32xf32> to vector<4x32xf32>
    %40 = arith.mulf %37, %39 : vector<4x32xf32>
    %c2 = arith.constant 2 : index
    %c0_12 = arith.constant 0 : index
    %41 = vector.load %arg4[%c2, %c0_12] : memref<3x32xf32, #tpu.memory_space<vmem>>, vector<1x32xf32>
    %42 = vector.broadcast %41 : vector<1x32xf32> to vector<4x32xf32>
    %43 = arith.addf %40, %42 : vector<4x32xf32>
    %cst_13 = arith.constant 0.000000e+00 : f32
    %44 = vector.broadcast %cst_13 : f32 to vector<4x32xf32>
    %45 = arith.maximumf %43, %44 : vector<4x32xf32>
    %c0_i32 = arith.constant 0 : i32
    %46 = arith.cmpi eq, %arg1, %c0_i32 : i32
    %47 = arith.extui %46 : i1 to i32
    %c0_i32_14 = arith.constant 0 : i32
    %48 = arith.cmpi ne, %47, %c0_i32_14 : i32
    scf.if %48 {
      %c0_17 = arith.constant 0 : index
      %c0_18 = arith.constant 0 : index
      %c0_19 = arith.constant 0 : index
      %55 = vector.load %arg5[%c0_17, %c0_18, %c0_19] : memref<1x1x32xf32, #tpu.memory_space<vmem>>, vector<1x1x32xf32>
      %56 = vector.shape_cast %55 : vector<1x1x32xf32> to vector<1x32xf32>
      %c0_20 = arith.constant 0 : index
      %c0_21 = arith.constant 0 : index
      %c0_22 = arith.constant 0 : index
      %57 = vector.load %arg6[%c0_20, %c0_21, %c0_22] : memref<1x5x32xf32, #tpu.memory_space<vmem>>, vector<1x1x32xf32>
      %58 = vector.shape_cast %57 : vector<1x1x32xf32> to vector<1x32xf32>
      %59 = vector.shape_cast %56 : vector<1x32xf32> to vector<1x1x32xf32>
      tpu.vector_store %arg6[%c0_20, %c0_21, %c0_22], %59 {strides = array<i32>} : memref<1x5x32xf32, #tpu.memory_space<vmem>>, vector<1x1x32xf32>,
    } else {
    }
    %c4_i32 = arith.constant 4 : i32
    %49 = arith.muli %arg1, %c4_i32 : i32
    %c1_i32 = arith.constant 1 : i32
    %50 = arith.addi %c1_i32, %49 : i32
    %c0_15 = arith.constant 0 : index
    %51 = arith.index_cast %50 : i32 to index
    %c0_16 = arith.constant 0 : index
    %52 = vector.load %arg6[%c0_15, %51, %c0_16] : memref<1x5x32xf32, #tpu.memory_space<vmem>>, vector<1x4x32xf32>
    %53 = vector.shape_cast %52 : vector<1x4x32xf32> to vector<4x32xf32>
    %54 = vector.shape_cast %45 : vector<4x32xf32> to vector<1x4x32xf32>
    tpu.vector_store %arg6[%c0_15, %51, %c0_16], %54 {strides = array<i32>} : memref<1x5x32xf32, #tpu.memory_space<vmem>>, vector<1x4x32xf32>,
    return
  }
  func.func @transform_0(%arg0: i32, %arg1: i32) -> (i32, i32, i32) {
    %c0_i32 = arith.constant 0 : i32
    %c0_i32_0 = arith.constant 0 : i32
    return %arg0, %c0_i32, %arg1 : i32, i32, i32
  }
  func.func @transform_1(%arg0: i32, %arg1: i32) -> (i32, i32) {
    %c0_i32 = arith.constant 0 : i32
    %c0_i32_0 = arith.constant 0 : i32
    %c0_i32_1 = arith.constant 0 : i32
    return %c0_i32, %c0_i32_0 : i32, i32
  }
  func.func @transform_2(%arg0: i32, %arg1: i32) -> (i32, i32) {
    %c0_i32 = arith.constant 0 : i32
    %c0_i32_0 = arith.constant 0 : i32
    %c0_i32_1 = arith.constant 0 : i32
    return %c0_i32, %c0_i32_0 : i32, i32
  }
  func.func @transform_3(%arg0: i32, %arg1: i32) -> (i32, i32, i32) {
    %c0_i32 = arith.constant 0 : i32
    %c0_i32_0 = arith.constant 0 : i32
    %c0_i32_1 = arith.constant 0 : i32
    return %arg0, %c0_i32, %c0_i32_0 : i32, i32, i32
  }
  func.func @transform_4(%arg0: i32, %arg1: i32) -> (i32, i32, i32) {
    %c0_i32 = arith.constant 0 : i32
    %c0_i32_0 = arith.constant 0 : i32
    %c0_i32_1 = arith.constant 0 : i32
    return %arg0, %c0_i32, %c0_i32_0 : i32, i32, i32
  }
}

</mosaic_0001>

<bundles_post_ra>
// kernel: tpu_custom_call.1
= control target key start
LH: loop header
LB: loop body
LE: loop exit
PB: predicated region body
PF: predicated region fallthrough
CT: control target
= control target key end

     0   :  { %9 = vsyncpa [#allocation3], 0  ;;  %s1055_s0 = inlined_call_operand.hbm [shape: f32[2,16,16], index: 0, kind: input, shape index: {}]   ;;  %s1056_s1 = inlined_call_operand.hbm [shape: f32[16,32], index: 1, kind: input, shape index: {}]   ;;  %s1057_s2 = inlined_call_operand.hbm [shape: f32[3,32], index: 2, kind: input, shape index: {}]   ;;  %s1058_s3 = inlined_call_operand.vmem [shape: f32[2,1,32], index: 3, kind: input, shape index: {}]   ;;  %s1059_s4 = inlined_call_operand.vmem [shape: f32[2,5,32], index: 4, kind: output, shape index: {}]  }
   0x1   :  { %11 = vsyncpa [#allocation3 + $0x1], 0 }
   0x2   :  { %12 = vsyncpa [#allocation5], 0  ;;  %s905_s15 = smov 0   ;;  %s907_s16 = smov 0  }
   0x3   :  { %s909_s17 = smov 0   ;;  %s911_s18 = smov 0  }
   0x4   :  { %s913_s19 = smov 0   ;;  %s915_s20 = smov 0  }
   0x5 LB: > { %s611_s21 = sadd.s32 4294967295, %s871_s20   ;;  %p52_p0 = scmp.ne.s32.totalorder %s855_s16, %s851_s15  ;;  %s871_s20 = sphi %s915_s20, %s18_s20   ;;  %s867_s19 = sphi %s913_s19, %s1069_s19   ;;  %s863_s18 = sphi %s911_s18, %s1068_s18   ;;  %s859_s17 = sphi %s909_s17, %s1067_s17   ;;  %s855_s16 = sphi %s907_s16, %s1066_s16   ;;  %s851_s15 = sphi %s905_s15, %s1065_s15  }
   0x6   : > { %p935_p1 = scmp.eq.s32.totalorder %s611_s21, 0  ;;  %p613_p2 = scmp.ge.s32.totalorder %s871_s20, 1 }
   0x7   : > { %p157_p3 = scmp.lt.s32.totalorder %s871_s20, 3  ;;  %s873_s25 = smov [#allocation4]  }
   0x8   : > { %p943_p4 = por %p935_p1, %p52_p0  ;;  %s169_s26 = sshll.u32 %s873_s25, 4  ;;  %s170_s26 = int_to_ptr.vmem [resolvable:$true] %s169_s26 }
   0x9   : > { %p947_p5 = pnand %p613_p2, %p157_p3  ;;  %s874_s28 = smov [#allocation6]  }
   0xa   : > { %s183_s29 = sshll.u32 %s874_s28, 4  ;;  %s748_s30 = scalar_lea.vmem %s170_s26, 256  ;;  %s184_s29 = int_to_ptr.vmem [resolvable:$true] %s183_s29 }
   0xb   : > { %p665_p6 = pneg %p947_p5  ;;  %p749_p9 = scmp.ne.s32.totalorder %s170_s26, %s748_s30 }
   0xc   : > { %p756_p12 = scmp.lt.s32.totalorder %s170_s26, %s170_s26  ;;  %p757_p13 = scmp.lt.s32.totalorder %s748_s30, %s748_s30 }
   0xd   : > { %p955_p7 = pnand %p665_p6, %p935_p1 }
   0xe   : > { %p758_p0 = por %p757_p13, %p756_p12 }
   0xf   : > { %p739_p8 = pneg %p955_p7 }
  0x11   : > { %p751_p10 = pnand %p749_p9, %p739_p8 }
  0x13   : > { %p752_p11 = pneg %p751_p10 }
  0x15   : > { %p759_p2 = pnand %p758_p0, %p752_p11 }
  0x17   : > { %762 = shalt.err (!%p759_p2)
}
  0x18   : > { %s875_s5 = smov 128   ;;  %s876_s6 = smov 8  }
  0x19   : > { %668 = dma.hbm_to_vmem [thread:$0]  (!%p955_p7), %s1056_s1, 256, %s170_s26, [#allocation5], %s875_s5, %s875_s5, %s876_s6  }
  0x1a   : > { %s774_s9 = scalar_lea.vmem %s184_s29, 64  ;;  %p782_p10 = scmp.lt.s32.totalorder %s184_s29, %s184_s29 }
  0x1b   : > { %p775_p3 = scmp.ne.s32.totalorder %s184_s29, %s774_s9  ;;  %p783_p11 = scmp.lt.s32.totalorder %s774_s9, %s774_s9 }
  0x1d   : > { %p777_p6 = pnand %p775_p3, %p739_p8  ;;  %p784_p12 = por %p783_p11, %p782_p10 }
  0x1f   : > { %p778_p9 = pneg %p777_p6 }
  0x21   : > { %p785_p13 = pnand %p784_p12, %p778_p9 }
  0x23   : > { %788 = shalt.err (!%p785_p13)
}
  0x24   : > { %671 = dma.hbm_to_vmem [thread:$0]  (!%p955_p7), %s1057_s2, 64, %s184_s29, [#allocation5]  }
  0x25   : > { %s30_s12 = sadd.s32 1, %s867_s19  ;;  %s39_s13 = sadd.s32 1, %s859_s17 }
  0x26   : > { %p32_p8 = scmp.ge.s32.totalorder %s30_s12, 2  ;;  %p46_p0 = scmp.ne.s32.totalorder %s859_s17, %s855_s16 }
  0x27   : > { %p47_p2 = scmp.eq.s32.totalorder %s871_s20, 0  ;;  %p678_p3 = scmp.lt.s32.totalorder %s871_s20, 2 }
  0x28   : > { %s1071_s12 = smov (%p32_p8, %s30_s12), 0  ;;  %s194_s14 = sand.u32 1, %s859_s17  }
  0x29   : > { %p48_p6 = por %p47_p2, %p46_p0  ;;  %s34_s15 = ssub.s32 %s867_s19, %s1071_s12 }
  0x2a   : > { %p37_p9 = scmp.eq.s32.totalorder %s34_s15, 0  ;;  %s617_s21 = sshll.u32 %s194_s14, 4 }
  0x2b   : > { %s644_s25 = sshll.u32 %s867_s19, 8  ;;  %s198_s30 = scalar_lea.vmem [#allocation2], %s617_s21 }
  0x2c   : > { %s993_s26 = scalar_select %p37_p9, %s859_s17, %s39_s13  }
  0x2d   : > { %s205_s29 = scalar_lea.hbm %s1055_s0, %s644_s25  ;;  %s206_s7 = sshll.u32 %s198_s30, 4  ;;  %s207_s7 = int_to_ptr.vmem [resolvable:$true] %s206_s7 }
  0x2e   : > { %p1000_p7 = pnand %p678_p3, %p48_p6  ;;  %s195_s9 = scalar_lea.sflag [#allocation3], %s194_s14 }
  0x2f   : > { %s802_s10 = scalar_lea.vmem %s207_s7, 256  ;;  %s877_s11 = smov [#allocation2]  }
  0x30   : > { %p791_p10 = pneg %p1000_p7  ;;  %p803_p11 = scmp.ne.s32.totalorder %s207_s7, %s802_s10 }
  0x31   : > { %s807_s13 = sshll.u32 %s877_s11, 4  ;;  %s808_s13 = int_to_ptr.vmem [resolvable:$false] %s807_s13 }
  0x32   : > { %p805_p12 = pnand %p803_p11, %p791_p10  ;;  %s809_s15 = scalar_lea.vmem %s808_s13, 512 }
  0x33   : > { %p810_p8 = scmp.lt.s32.totalorder %s207_s7, %s808_s13  ;;  %p811_p0 = scmp.lt.s32.totalorder %s809_s15, %s802_s10 }
  0x34   : > { %p806_p13 = pneg %p805_p12 }
  0x35   : > { %p812_p2 = por %p811_p0, %p810_p8 }
  0x37   : > { %p813_p9 = pnand %p812_p2, %p806_p13 }
  0x39   : > { %816 = shalt.err (!%p813_p9)
}
  0x3a   : > { %675 = dma.hbm_to_vmem [thread:$0]  (!%p1000_p7), %s205_s29, 256, %s207_s7, %s195_s9, %s875_s5, %s875_s5, %s876_s6  }
  0x3b   : > { %224 = sbr.rel (%p947_p5) target bundleno = 716 (0x2cc), region = 36  ;;  %s226_s14 = sand.u32 (!%p947_p5), 1, %s855_s16  }
  0x3c   : > { %s621_s21 = sshll.u32 (!%p947_p5), %s226_s14, 4  ;;  %s227_s25 = scalar_lea.sflag (!%p947_p5), [#allocation3], %s226_s14 }
  0x3d   : > { %s230_s27 = scalar_lea.vmem (!%p947_p5), [#allocation2], %s621_s21 }
  0x40   : > { %842 = dma.done.wait (%p943_p4), %s227_s25, 256  }
  0x41   : > { %844 = vsyncadd (%p943_p4), %s227_s25, 4294967040 }
  0x42   : > { %846 = dma.done.wait (%p935_p1), [#allocation5], 320  }
  0x43   : > { %848 = vsyncadd (%p935_p1), [#allocation5], 4294966976  ;;  %p265_p5 = scmp.lt.s32.totalorder %s863_s18, 1  ;;  %vm499_vm0 = vcmask 253952   ;;  %v272_v1 = vld [vmem:[%s230_s27] sm:$0xff]  ;;  %v273_v2 = vld [vmem:[%s230_s27 + $0x8] sm:$0xff]  ;;  %v371_v7 = vlaneseq }
  0x44   : > { %274 = vxpose.xlu0.b32.start [1/2] (short) (narrow) %v272_v1, 16  ;;  %v361_v3 = vld [vmem:[#allocation4 + $0x8] sm:$0xff]  ;;  %v878_v4 = vmov 0.0   ;;  %v360_v5 = vld [vmem:[#allocation4] sm:$0xff]  ;;  %vm879_vm1 = vmmov 0   ;;  %vm387_vm2 = vcmask 1041409  }
  0x45   : > { %s1073_s18 = smov (!%p265_p5, %s863_s18), 1  ;;  %648 = vmatprep.subr.mxu0 %v878_v4  ;;  %652 = vmatprep.mubr.msk.f32.mxu0 %vm879_vm1, %v878_v4  ;;  %v372_v13 = vshrl.u32 %v371_v7, 7  ;;  %vm389_vm3 = vcmask 1042434   ;;  %vm391_vm4 = vcmask 1043459   ;;  %vm393_vm5 = vcmask 130048  }
  0x46   : > { %s267_s6 = scalar_lea.vmem %s1058_s3, %s1073_s18  ;;  %s624_s28 = sshll.u32 %s1073_s18, 3  ;;  %649 = vmatpush3.msra.mxu0 %v361_v3  ;;  %v637_v44 = vld [vmem:[#allocation6] ss:$0 sm:$0xff]  ;;  %vm466_vm6 = vcmask 257024   ;;  %v639_v58 = vld [vmem:[#allocation6 + $0x1] ss:$0 sm:$0xff] }
  0x47   : > { %s1030_s23 = scalar_lea.vmem %s1059_s4, %s624_s28  ;;  %v498_v0 = vld [vmem:[%s267_s6] sm:$0x1]  ;;  %650 = vmatprep.subr.mxu0 %v878_v4  ;;  %v373_v25 = vsub.s32 0, %v372_v13  ;;  %v640_v60 = vld [vmem:[#allocation6 + $0x2] ss:$0 sm:$0xff] }
  0x48   : > { %500 = vst.msk [vmem:[%s1030_s23] sm:$0x1] %vm499_vm0, %v498_v0  ;;  %275 = vxpose.xlu0.b32.end [2/2] (short) (narrow) %v273_v2, 16  ;;  %651 = vmatpush3.msra.mxu0 %v360_v5 }
  0xc0   : > { %v290_v6 = vpop.trf.xlu0 }
  0xc1   : > { %v308_v8 = vcombine.high %v290_v6, %v290_v6  ;;  %v625_v9 = vrot.slane %v290_v6, 9  ;;  %v629_v12 = vrot.slane %v290_v6, 10  ;;  %v633_v20 = vrot.slane %v290_v6, 11 }
  0xc3   : > { %v626_v10 = vrot.slane %v308_v8, 9  ;;  %v324_v11 = vadd.f32 %v625_v9, %v290_v6  ;;  %v630_v19 = vrot.slane %v308_v8, 10  ;;  %v634_v27 = vrot.slane %v308_v8, 11 }
  0xc4   : > { %v291_v14 = vpop.trf.xlu0 }
  0xc5   : > { %v325_v15 = vadd.f32 %v626_v10, %v308_v8  ;;  %v340_v16 = vadd.f32 %v629_v12, %v324_v11  ;;  %v309_v17 = vcombine.high %v291_v14, %v291_v14  ;;  %v627_v18 = vrot.slane %v291_v14, 9 }
  0xc6   : > { %v631_v23 = vrot.slane %v291_v14, 10  ;;  %v635_v31 = vrot.slane %v291_v14, 11 }
  0xc7   : > { %v628_v21 = vrot.slane %v309_v17, 9  ;;  %v326_v22 = vadd.f32 %v627_v18, %v291_v14  ;;  %v356_v24 = vadd.f32 %v633_v20, %v340_v16  ;;  %v341_v26 = vadd.f32 %v630_v19, %v325_v15 }
  0xc8   : > { %v632_v29 = vrot.slane %v309_v17, 10  ;;  %v636_v35 = vrot.slane %v309_v17, 11 }
  0xc9   : > { %v327_v28 = vadd.f32 %v628_v21, %v309_v17  ;;  %v342_v30 = vadd.f32 %v631_v23, %v326_v22  ;;  %v357_v32 = vadd.f32 %v634_v27, %v341_v26  ;;  %v374_v36 = vrot.slane %v356_v24, %v373_v25 }
  0xcb   : > { %v358_v33 = vadd.f32 %v635_v31, %v342_v30  ;;  %v343_v34 = vadd.f32 %v632_v29, %v327_v28  ;;  %v378_v37 = vrot.slane %v357_v32, %v373_v25 }
  0xcd   : > { %v382_v38 = vrot.slane %v358_v33, %v373_v25  ;;  %v359_v39 = vadd.f32 %v636_v35, %v343_v34  ;;  %v388_v40 = vsel %vm387_vm2, %v378_v37, %v374_v36 }
  0xcf   : > { %v386_v41 = vrot.slane %v359_v39, %v373_v25  ;;  %v390_v42 = vsel %vm389_vm3, %v382_v38, %v388_v40 }
  0xd1   : > { %v392_v43 = vsel %vm391_vm4, %v386_v41, %v390_v42 }
  0xd2   : > { %653 = vmatmul.mubr.msk.f32.vlgmr.msra.gmra.mxu0 %vm393_vm5, %v392_v43 }
 0x192   : > { %v462_v45 = vpop.f32.mrf.mxu0 }
 0x193   : > { %v463_v46 = vadd.f32 %v637_v44, %v462_v45 }
 0x194   : > { %v654_v47 = vpop.f32.mrf.mxu0 }
 0x195   : > { %v467_v48 = vsel %vm466_vm6, %v463_v46, 0.0 }
 0x196   : > { %468 = vadd.xlane.f32.xlu1 %v467_v48 }
 0x21f   : > { %v469_v49 = vpop.xlane.xlu1 %468 }
 0x220   : > { %v471_v50 = vmul.f32 0.03125, %v469_v49 }
 0x222   : > { %v472_v51 = vsub.f32 %v463_v46, %v471_v50 }
 0x224   : > { %v473_v52 = vmul.f32 %v472_v51, %v472_v51 }
 0x226   : > { %v474_v53 = vsel %vm466_vm6, %v473_v52, 0.0 }
 0x227   : > { %475 = vadd.xlane.f32.xlu1 %v474_v53 }
 0x2b0   : > { %v476_v54 = vpop.xlane.xlu1 %475 }
 0x2b1   : > { %v477_v55 = vmul.f32 0.03125, %v476_v54 }
 0x2b3   : > { %v478_v56 = vadd.f32 1e-06, %v477_v55 }
 0x2b5   : > { %735 = vrsqrt.f32 %v478_v56 }
 0x2c2   : > { %v736_v57 = vpop.eup %735 }
 0x2c3   : > { %v480_v59 = vmul.f32 %v736_v57, %v472_v51 }
 0x2c5   : > { %v486_v61 = vmul.f32 %v639_v58, %v480_v59 }
 0x2c7   : > { %v492_v62 = vadd.f32 %v640_v60, %v486_v61 }
 0x2c9   : > { %v493_v63 = vmax.f32 %v492_v62, 0.0 }
 0x2cb   : > { %641 = vst.msk [vmem:[%s1030_s23 + $0x1] sm:$0xf] %vm466_vm6, %v493_v63 }
 0x2cc PF: > { %s18_s20 = sadd.s32 1, %s871_s20   ;;  %s1065_s15 = smov %s855_s16 }
 0x2cd   : > { %p15_p1 = scmp.ge.s32.totalorder %s18_s20, 4   ;;  %s1066_s16 = smov %s859_s17 }
 0x2ce   : > { %s1067_s17 = smov %s993_s26  ;;  %s1068_s18 = smov %s867_s19 }
 0x2cf   : > { %s1069_s19 = smov %s1071_s12  ;;  %17 = sbr.rel (!%p15_p1) target bundleno = 5 (0x5), region = 92 }
 0x2d4   :  { %524 = vsyncpa [#allocation3], 1 }
 0x2d5   :  { %526 = vsyncpa [#allocation3 + $0x1], 1 }
 0x2d6   :  { %527 = vsyncpa [#allocation5], 1 }

</bundles_post_ra>
